<compile_context>
chip_gen: v5e
topology: v5e:2x2
jax: 0.10.0
libtpu: 0.0.40
codegen_flags: <defaults>
</compile_context>

<pallas_src>
import jax
import jax.numpy as jnp
from jax import lax
from jax.experimental import pallas as pl
from jax.experimental.pallas import tpu as pltpu


def _make_kernel(*, s, K, H, W_out, Cin, Cout, phase_meta, eps):
    """phase_meta[rh] = (tuple of padded input-row offsets, folded weight width)."""
    H_out = H * s

    def kernel(x_ref, w_ref, g_ref, b_ref, o_ref):
        # x_ref : (1, K*Cin, Hp*W_out)   bf16  (W-im2col'd, H halo-padded, W zero-dilated)
        # w_ref : (s, Cout, Tmax*K*Cin)  bf16  (per-phase folded taps, zero padded)
        # g_ref : (Cout, 1) f32 ; b_ref : (Cout, 1) f32
        # o_ref : (1, Cout, H_out*W_out) f32   (flattened NCHW; reshaped for free outside)

        # ---- pass 1: one MXU matmul per H-phase covering ALL its output rows ------
        ys = []
        for rh in range(s):                               # static: s phases along H
            row_offs, width = phase_meta[rh]
            wf = w_ref[rh, :, :width]                     # (Cout, n_h*K*Cin) bf16
            slabs = []
            for dhp in row_offs:                          # the n_h real input rows
                for kw in range(K):                       # W taps (pre-sliced in xcol)
                    slabs.append(
                        x_ref[0,
                              kw * Cin:(kw + 1) * Cin,
                              dhp * W_out:(dhp + H) * W_out])   # (Cin, H*W_out) contiguous
            patch = jnp.concatenate(slabs, axis=0)        # (n_h*K*Cin, H*W_out) bf16
            ys.append(jnp.dot(wf, patch,
                              preferred_element_type=jnp.float32))  # (Cout, H*W_out) f32

        # ---- interleave the s phases along lanes (pixel shuffle along H, in VMEM) -
        if s == 1:
            conv = ys[0]
        else:
            pieces = []
            for qh in range(H):
                for rh in range(s):
                    pieces.append(ys[rh][:, qh * W_out:(qh + 1) * W_out])
            conv = jnp.concatenate(pieces, axis=1)        # (Cout, H_out*W_out) f32

        # ---- InstanceNorm (two-pass: mean, then centered variance) + affine + ReLU -
        cnt = jnp.float32(H_out * W_out)
        mean = jnp.sum(conv, axis=1, keepdims=True) / cnt                 # (Cout, 1)
        var = jnp.sum((conv - mean) * (conv - mean), axis=1, keepdims=True) / cnt
        scale = lax.rsqrt(var + eps) * g_ref[...]                         # (Cout, 1)
        shift = b_ref[...] - mean * scale                                 # (Cout, 1)

        # one fused whole-slab sweep + one dense, unmasked, lane-dense store
        o_ref[0, :, :] = jnp.maximum(conv * scale + shift, 0.0)

    return kernel


def conv_transpose_layer(x_nchw, weight_t, gamma, beta, *, stride, eps=1e-5):
    """ConvTranspose2d(K, stride, padding=K//2, output_padding=stride-1)
       + InstanceNorm2d(affine=True) + ReLU.

    x_nchw  : (N, Cin, H, W) float32
    weight_t: (Cin, Cout, K, K)  -- PyTorch ConvTranspose2d weight layout
    gamma   : (Cout,), beta: (Cout,)
    returns : (N, Cout, H*stride, W*stride) float32, NCHW
    """
    N, Cin, H, W = x_nchw.shape
    Cin_w, Cout, K, K2 = weight_t.shape
    assert Cin_w == Cin and K == K2
    assert K % 2 == 1, "ConvTransposeLayer assumes odd kernel_size (padding = K//2)."
    s = int(stride)
    p = K // 2
    op = s - 1
    H_out = (H - 1) * s - 2 * p + K + op
    W_out = (W - 1) * s - 2 * p + K + op
    assert H_out == H * s and W_out == W * s

    # ---- H axis: per-phase tap metadata (sub-pixel decomposition, no dilation) ----
    metas = []
    ph_l, ph_r = 0, 0
    for rh in range(s):
        c = (rh + p) % s
        n_h = len(range(c, K, s))
        base = (rh + p) // s
        rel = [base - (n_h - 1) + t for t in range(n_h)]          # input-row offsets
        kh_order = [c + (n_h - 1 - t) * s for t in range(n_h)]    # matching kernel taps
        metas.append((rel, kh_order))
        ph_l = max(ph_l, -min(rel))
        ph_r = max(ph_r, max(rel))
    Tmax = max(len(m[0]) for m in metas)

    # ---- W axis: zero-dilate by s + edge pads so a stride-1 correlation with the
    #      W-flipped taps reproduces the transposed conv along W.
    lo_w = K - 1 - p
    hi_w = K - 1 - p + op
    x_pad = lax.pad(
        x_nchw.astype(jnp.bfloat16), jnp.asarray(0, jnp.bfloat16),
        ((0, 0, 0), (0, 0, 0), (ph_l, ph_r, 0), (lo_w, hi_w, s - 1)))
    Hp, Wp = x_pad.shape[2], x_pad.shape[3]
    assert Wp - (K - 1) == W_out and Hp == H + ph_l + ph_r

    # ---- W-only im2col so every kernel slab is one contiguous (Cin, H*W_out) slice:
    #      xcol[n, kw*Cin + c, h*W_out + ow] = x_pad[n, c, h, kw + ow]
    xcol = jnp.stack([x_pad[:, :, :, kw:kw + W_out] for kw in range(K)], axis=1)
    xcol = xcol.reshape(N, K * Cin, Hp * W_out)

    # ---- fold all taps of a phase into one (Cout, n_h*K*Cin) weight matrix --------
    TKC = Tmax * K * Cin
    w_f32 = weight_t.astype(jnp.float32)
    w_all = jnp.zeros((s, Cout, TKC), jnp.float32)
    phase_meta = []
    for rh in range(s):
        rel, kh_order = metas[rh]
        blocks = []
        for kh in kh_order:
            for kw in range(K):
                blocks.append(jnp.transpose(w_f32[:, :, kh, K - 1 - kw]))  # (Cout, Cin)
        wf = jnp.concatenate(blocks, axis=1)                               # (Cout, n_h*K*Cin)
        w_all = w_all.at[rh, :, :wf.shape[1]].set(wf)
        phase_meta.append((tuple(r + ph_l for r in rel), int(wf.shape[1])))
    w_all = w_all.astype(jnp.bfloat16)

    gamma2 = gamma.reshape(Cout, 1).astype(jnp.float32)
    beta2 = beta.reshape(Cout, 1).astype(jnp.float32)

    kernel = _make_kernel(s=s, K=K, H=H, W_out=W_out, Cin=Cin, Cout=Cout,
                          phase_meta=tuple(phase_meta), eps=float(eps))

    HW_in = Hp * W_out
    HW_out = H_out * W_out
    in_bytes = K * Cin * HW_in * 2
    out_bytes = Cout * HW_out * 4
    w_bytes = s * Cout * TKC * 2
    # 2x double-buffered in/out blocks + weights + in-kernel live values, <= 48 MiB.
    need = 2 * (in_bytes + out_bytes) + w_bytes + 3 * out_bytes + 2 * in_bytes + (2 << 20)
    vmem_limit = int(min(48 * 1024 * 1024, max(16 * 1024 * 1024, need)))

    y = pl.pallas_call(
        kernel,
        out_shape=jax.ShapeDtypeStruct((N, Cout, HW_out), jnp.float32),
        grid_spec=pltpu.PrefetchScalarGridSpec(
            num_scalar_prefetch=0,
            grid=(N,),
            in_specs=[
                pl.BlockSpec((1, K * Cin, HW_in), lambda n: (n, 0, 0)),
                pl.BlockSpec((s, Cout, TKC), lambda n: (0, 0, 0)),
                pl.BlockSpec((Cout, 1), lambda n: (0, 0)),
                pl.BlockSpec((Cout, 1), lambda n: (0, 0)),
            ],
            out_specs=pl.BlockSpec((1, Cout, HW_out), lambda n: (n, 0, 0)),
        ),
        compiler_params=pltpu.CompilerParams(
            dimension_semantics=("parallel",),
            vmem_limit_bytes=vmem_limit,
        ),
    )(xcol, w_all, gamma2, beta2)

    # Free metadata reshape back to NCHW (flattened lanes are already in NCHW order).
    return y.reshape(N, Cout, H_out, W_out)


def _reference(x_nchw, weight_t, gamma, beta, *, stride, eps=1e-5):
    """Pure-JAX reference matching PyTorch semantics (for correctness check)."""
    _, Cout, K, _ = weight_t.shape
    p = K // 2
    op = stride - 1
    lo = K - 1 - p
    hi = K - 1 - p + op
    w_oihw = jnp.transpose(weight_t[:, :, ::-1, ::-1], (1, 0, 2, 3))
    y = lax.conv_general_dilated(
        x_nchw, w_oihw, window_strides=(1, 1),
        padding=((lo, hi), (lo, hi)),
        lhs_dilation=(stride, stride),
        dimension_numbers=('NCHW', 'OIHW', 'NCHW'),
        preferred_element_type=jnp.float32)
    mean = jnp.mean(y, axis=(2, 3), keepdims=True)
    var = jnp.mean((y - mean) ** 2, axis=(2, 3), keepdims=True)
    y = (y - mean) / jnp.sqrt(var + eps)
    y = y * gamma.reshape(1, Cout, 1, 1) + beta.reshape(1, Cout, 1, 1)
    return jnp.maximum(y, 0.0)


if __name__ == "__main__":
    key = jax.random.PRNGKey(0)
    k_x, k_w, k_g, k_b = jax.random.split(key, 4)

    # Small, deterministic shapes consistent with the module.
    N, Cin, Cout, H, W = 2, 4, 8, 16, 16
    K, stride = 3, 2

    x = jax.random.normal(k_x, (N, Cin, H, W), jnp.float32)
    weight_t = 0.2 * jax.random.normal(k_w, (Cin, Cout, K, K), jnp.float32)
    gamma = 1.0 + 0.1 * jax.random.normal(k_g, (Cout,), jnp.float32)
    beta = 0.1 * jax.random.normal(k_b, (Cout,), jnp.float32)

    out = conv_transpose_layer(x, weight_t, gamma, beta, stride=stride)
    out = jax.block_until_ready(out)
    assert out.shape == (N, Cout, H * stride, W * stride), out.shape

    # Tight check against a reference fed the SAME bf16-quantized inputs
    # (validates the phase/tap/im2col math; both sides accumulate in f32).
    xq = x.astype(jnp.bfloat16).astype(jnp.float32)
    wq = weight_t.astype(jnp.bfloat16).astype(jnp.float32)
    ref_q = _reference(xq, wq, gamma, beta, stride=stride)
    err_q = float(jnp.max(jnp.abs(out - ref_q)))
    assert jnp.allclose(out, ref_q, atol=2e-3, rtol=2e-3), err_q

    # Fidelity to the full-f32 PyTorch-semantics reference (bf16 matmul inputs only).
    ref = _reference(x, weight_t, gamma, beta, stride=stride)
    err = float(jnp.max(jnp.abs(out - ref)))
    assert jnp.allclose(out, ref, atol=5e-2, rtol=5e-2), err

    print("KERNEL_OK")
</pallas_src>

<mosaic_0001>
module attributes {stable_mosaic.version = 11 : i64} {
  func.func @kernel(%arg0: i32, %arg1: memref<1x12x544xbf16, #tpu.memory_space<vmem>>, %arg2: memref<2x8x24xbf16, #tpu.memory_space<vmem>>, %arg3: memref<8x1xf32, #tpu.memory_space<vmem>>, %arg4: memref<8x1xf32, #tpu.memory_space<vmem>>, %arg5: memref<1x8x1024xf32, #tpu.memory_space<vmem>>) attributes {dimension_semantics = [#tpu.dimension_semantics<parallel>], iteration_bounds = array<i64: 2>, scalar_prefetch = 0 : i64, scratch_operands = 0 : i64, tpu.core_type = #tpu.core_type<tc>, window_params = [{transform_indices = @transform_0, window_bounds = array<i64: 1, 12, 544>}, {pipeline_mode = #tpu.pipeline_mode<synchronous>, transform_indices = @transform_1, window_bounds = array<i64: 2, 8, 24>}, {pipeline_mode = #tpu.pipeline_mode<synchronous>, transform_indices = @transform_2, window_bounds = array<i64: 8, 1>}, {pipeline_mode = #tpu.pipeline_mode<synchronous>, transform_indices = @transform_3, window_bounds = array<i64: 8, 1>}, {transform_indices = @transform_4, window_bounds = array<i64: 1, 8, 1024>}]} {
    %c0 = arith.constant 0 : index
    %c0_0 = arith.constant 0 : index
    %c0_1 = arith.constant 0 : index
    %0 = vector.load %arg2[%c0, %c0_0, %c0_1] : memref<2x8x24xbf16, #tpu.memory_space<vmem>>, vector<1x8x12xbf16>
    %1 = vector.shape_cast %0 : vector<1x8x12xbf16> to vector<8x12xbf16>
    %c0_2 = arith.constant 0 : index
    %c0_3 = arith.constant 0 : index
    %c0_4 = arith.constant 0 : index
    %2 = vector.load %arg1[%c0_2, %c0_3, %c0_4] : memref<1x12x544xbf16, #tpu.memory_space<vmem>>, vector<1x4x512xbf16>
    %3 = vector.shape_cast %2 : vector<1x4x512xbf16> to vector<4x512xbf16>
    %c0_5 = arith.constant 0 : index
    %c4 = arith.constant 4 : index
    %c0_6 = arith.constant 0 : index
    %4 = vector.load %arg1[%c0_5, %c4, %c0_6] : memref<1x12x544xbf16, #tpu.memory_space<vmem>>, vector<1x4x512xbf16>
    %5 = vector.shape_cast %4 : vector<1x4x512xbf16> to vector<4x512xbf16>
    %c0_7 = arith.constant 0 : index
    %c8 = arith.constant 8 : index
    %c0_8 = arith.constant 0 : index
    %6 = vector.load %arg1[%c0_7, %c8, %c0_8] : memref<1x12x544xbf16, #tpu.memory_space<vmem>>, vector<1x4x512xbf16>
    %7 = vector.shape_cast %6 : vector<1x4x512xbf16> to vector<4x512xbf16>
    %8 = tpu.concatenate %3, %5, %7 in 0 : vector<4x512xbf16>, vector<4x512xbf16>, vector<4x512xbf16> -> vector<12x512xbf16>
    %cst = arith.constant dense<0.000000e+00> : vector<8x512xf32>
    %9 = tpu.matmul %1, %8, %cst {dimension_numbers = #tpu.dot_dimension_numbers<[1], [0], [0], [1], [0, 0, 1, 1], [], []>} : vector<8x12xbf16>, vector<12x512xbf16>, vector<8x512xf32> -> vector<8x512xf32>
    %c1 = arith.constant 1 : index
    %c0_9 = arith.constant 0 : index
    %c0_10 = arith.constant 0 : index
    %10 = vector.load %arg2[%c1, %c0_9, %c0_10] : memref<2x8x24xbf16, #tpu.memory_space<vmem>>, vector<1x8x24xbf16>
    %11 = vector.shape_cast %10 : vector<1x8x24xbf16> to vector<8x24xbf16>
    %c0_11 = arith.constant 0 : index
    %c0_12 = arith.constant 0 : index
    %c0_13 = arith.constant 0 : index
    %12 = vector.load %arg1[%c0_11, %c0_12, %c0_13] : memref<1x12x544xbf16, #tpu.memory_space<vmem>>, vector<1x4x512xbf16>
    %13 = vector.shape_cast %12 : vector<1x4x512xbf16> to vector<4x512xbf16>
    %c0_14 = arith.constant 0 : index
    %c4_15 = arith.constant 4 : index
    %c0_16 = arith.constant 0 : index
    %14 = vector.load %arg1[%c0_14, %c4_15, %c0_16] : memref<1x12x544xbf16, #tpu.memory_space<vmem>>, vector<1x4x512xbf16>
    %15 = vector.shape_cast %14 : vector<1x4x512xbf16> to vector<4x512xbf16>
    %c0_17 = arith.constant 0 : index
    %c8_18 = arith.constant 8 : index
    %c0_19 = arith.constant 0 : index
    %16 = vector.load %arg1[%c0_17, %c8_18, %c0_19] : memref<1x12x544xbf16, #tpu.memory_space<vmem>>, vector<1x4x512xbf16>
    %17 = vector.shape_cast %16 : vector<1x4x512xbf16> to vector<4x512xbf16>
    %c0_20 = arith.constant 0 : index
    %c0_21 = arith.constant 0 : index
    %c32 = arith.constant 32 : index
    %18 = vector.load %arg1[%c0_20, %c0_21, %c32] : memref<1x12x544xbf16, #tpu.memory_space<vmem>>, vector<1x4x512xbf16>
    %19 = vector.shape_cast %18 : vector<1x4x512xbf16> to vector<4x512xbf16>
    %c0_22 = arith.constant 0 : index
    %c4_23 = arith.constant 4 : index
    %c32_24 = arith.constant 32 : index
    %20 = vector.load %arg1[%c0_22, %c4_23, %c32_24] : memref<1x12x544xbf16, #tpu.memory_space<vmem>>, vector<1x4x512xbf16>
    %21 = vector.shape_cast %20 : vector<1x4x512xbf16> to vector<4x512xbf16>
    %c0_25 = arith.constant 0 : index
    %c8_26 = arith.constant 8 : index
    %c32_27 = arith.constant 32 : index
    %22 = vector.load %arg1[%c0_25, %c8_26, %c32_27] : memref<1x12x544xbf16, #tpu.memory_space<vmem>>, vector<1x4x512xbf16>
    %23 = vector.shape_cast %22 : vector<1x4x512xbf16> to vector<4x512xbf16>
    %24 = tpu.concatenate %13, %15, %17, %19, %21, %23 in 0 : vector<4x512xbf16>, vector<4x512xbf16>, vector<4x512xbf16>, vector<4x512xbf16>, vector<4x512xbf16>, vector<4x512xbf16> -> vector<24x512xbf16>
    %cst_28 = arith.constant dense<0.000000e+00> : vector<8x512xf32>
    %25 = tpu.matmul %11, %24, %cst_28 {dimension_numbers = #tpu.dot_dimension_numbers<[1], [0], [0], [1], [0, 0, 1, 1], [], []>} : vector<8x24xbf16>, vector<24x512xbf16>, vector<8x512xf32> -> vector<8x512xf32>
    %26 = vector.extract_strided_slice %9 {offsets = [0, 0], sizes = [8, 32], strides = [1, 1]} : vector<8x512xf32> to vector<8x32xf32>
    %27 = vector.extract_strided_slice %25 {offsets = [0, 0], sizes = [8, 32], strides = [1, 1]} : vector<8x512xf32> to vector<8x32xf32>
    %28 = vector.extract_strided_slice %9 {offsets = [0, 32], sizes = [8, 32], strides = [1, 1]} : vector<8x512xf32> to vector<8x32xf32>
    %29 = vector.extract_strided_slice %25 {offsets = [0, 32], sizes = [8, 32], strides = [1, 1]} : vector<8x512xf32> to vector<8x32xf32>
    %30 = vector.extract_strided_slice %9 {offsets = [0, 64], sizes = [8, 32], strides = [1, 1]} : vector<8x512xf32> to vector<8x32xf32>
    %31 = vector.extract_strided_slice %25 {offsets = [0, 64], sizes = [8, 32], strides = [1, 1]} : vector<8x512xf32> to vector<8x32xf32>
    %32 = vector.extract_strided_slice %9 {offsets = [0, 96], sizes = [8, 32], strides = [1, 1]} : vector<8x512xf32> to vector<8x32xf32>
    %33 = vector.extract_strided_slice %25 {offsets = [0, 96], sizes = [8, 32], strides = [1, 1]} : vector<8x512xf32> to vector<8x32xf32>
    %34 = vector.extract_strided_slice %9 {offsets = [0, 128], sizes = [8, 32], strides = [1, 1]} : vector<8x512xf32> to vector<8x32xf32>
    %35 = vector.extract_strided_slice %25 {offsets = [0, 128], sizes = [8, 32], strides = [1, 1]} : vector<8x512xf32> to vector<8x32xf32>
    %36 = vector.extract_strided_slice %9 {offsets = [0, 160], sizes = [8, 32], strides = [1, 1]} : vector<8x512xf32> to vector<8x32xf32>
    %37 = vector.extract_strided_slice %25 {offsets = [0, 160], sizes = [8, 32], strides = [1, 1]} : vector<8x512xf32> to vector<8x32xf32>
    %38 = vector.extract_strided_slice %9 {offsets = [0, 192], sizes = [8, 32], strides = [1, 1]} : vector<8x512xf32> to vector<8x32xf32>
    %39 = vector.extract_strided_slice %25 {offsets = [0, 192], sizes = [8, 32], strides = [1, 1]} : vector<8x512xf32> to vector<8x32xf32>
    %40 = vector.extract_strided_slice %9 {offsets = [0, 224], sizes = [8, 32], strides = [1, 1]} : vector<8x512xf32> to vector<8x32xf32>
    %41 = vector.extract_strided_slice %25 {offsets = [0, 224], sizes = [8, 32], strides = [1, 1]} : vector<8x512xf32> to vector<8x32xf32>
    %42 = vector.extract_strided_slice %9 {offsets = [0, 256], sizes = [8, 32], strides = [1, 1]} : vector<8x512xf32> to vector<8x32xf32>
    %43 = vector.extract_strided_slice %25 {offsets = [0, 256], sizes = [8, 32], strides = [1, 1]} : vector<8x512xf32> to vector<8x32xf32>
    %44 = vector.extract_strided_slice %9 {offsets = [0, 288], sizes = [8, 32], strides = [1, 1]} : vector<8x512xf32> to vector<8x32xf32>
    %45 = vector.extract_strided_slice %25 {offsets = [0, 288], sizes = [8, 32], strides = [1, 1]} : vector<8x512xf32> to vector<8x32xf32>
    %46 = vector.extract_strided_slice %9 {offsets = [0, 320], sizes = [8, 32], strides = [1, 1]} : vector<8x512xf32> to vector<8x32xf32>
    %47 = vector.extract_strided_slice %25 {offsets = [0, 320], sizes = [8, 32], strides = [1, 1]} : vector<8x512xf32> to vector<8x32xf32>
    %48 = vector.extract_strided_slice %9 {offsets = [0, 352], sizes = [8, 32], strides = [1, 1]} : vector<8x512xf32> to vector<8x32xf32>
    %49 = vector.extract_strided_slice %25 {offsets = [0, 352], sizes = [8, 32], strides = [1, 1]} : vector<8x512xf32> to vector<8x32xf32>
    %50 = vector.extract_strided_slice %9 {offsets = [0, 384], sizes = [8, 32], strides = [1, 1]} : vector<8x512xf32> to vector<8x32xf32>
    %51 = vector.extract_strided_slice %25 {offsets = [0, 384], sizes = [8, 32], strides = [1, 1]} : vector<8x512xf32> to vector<8x32xf32>
    %52 = vector.extract_strided_slice %9 {offsets = [0, 416], sizes = [8, 32], strides = [1, 1]} : vector<8x512xf32> to vector<8x32xf32>
    %53 = vector.extract_strided_slice %25 {offsets = [0, 416], sizes = [8, 32], strides = [1, 1]} : vector<8x512xf32> to vector<8x32xf32>
    %54 = vector.extract_strided_slice %9 {offsets = [0, 448], sizes = [8, 32], strides = [1, 1]} : vector<8x512xf32> to vector<8x32xf32>
    %55 = vector.extract_strided_slice %25 {offsets = [0, 448], sizes = [8, 32], strides = [1, 1]} : vector<8x512xf32> to vector<8x32xf32>
    %56 = vector.extract_strided_slice %9 {offsets = [0, 480], sizes = [8, 32], strides = [1, 1]} : vector<8x512xf32> to vector<8x32xf32>
    %57 = vector.extract_strided_slice %25 {offsets = [0, 480], sizes = [8, 32], strides = [1, 1]} : vector<8x512xf32> to vector<8x32xf32>
    %58 = tpu.concatenate %26, %27, %28, %29, %30, %31, %32, %33, %34, %35, %36, %37, %38, %39, %40, %41 in 1 : vector<8x32xf32>, vector<8x32xf32>, vector<8x32xf32>, vector<8x32xf32>, vector<8x32xf32>, vector<8x32xf32>, vector<8x32xf32>, vector<8x32xf32>, vector<8x32xf32>, vector<8x32xf32>, vector<8x32xf32>, vector<8x32xf32>, vector<8x32xf32>, vector<8x32xf32>, vector<8x32xf32>, vector<8x32xf32> -> vector<8x512xf32>
    %59 = tpu.concatenate %42, %43, %44, %45, %46, %47, %48, %49, %50, %51, %52, %53, %54, %55, %56, %57 in 1 : vector<8x32xf32>, vector<8x32xf32>, vector<8x32xf32>, vector<8x32xf32>, vector<8x32xf32>, vector<8x32xf32>, vector<8x32xf32>, vector<8x32xf32>, vector<8x32xf32>, vector<8x32xf32>, vector<8x32xf32>, vector<8x32xf32>, vector<8x32xf32>, vector<8x32xf32>, vector<8x32xf32>, vector<8x32xf32> -> vector<8x512xf32>
    %60 = tpu.concatenate %58, %59 in 1 : vector<8x512xf32>, vector<8x512xf32> -> vector<8x1024xf32>
    %cst_29 = arith.constant dense<0.000000e+00> : vector<8xf32>
    %61 = vector.multi_reduction <add>, %60, %cst_29 [1] : vector<8x1024xf32> to vector<8xf32>
    %62 = vector.shape_cast %61 : vector<8xf32> to vector<8x1xf32>
    %cst_30 = arith.constant 1.024000e+03 : f32
    %63 = vector.broadcast %cst_30 : f32 to vector<8x1xf32>
    %64 = arith.divf %62, %63 : vector<8x1xf32>
    %65 = vector.broadcast %64 : vector<8x1xf32> to vector<8x1024xf32>
    %66 = arith.subf %60, %65 : vector<8x1024xf32>
    %67 = vector.broadcast %64 : vector<8x1xf32> to vector<8x1024xf32>
    %68 = arith.subf %60, %67 : vector<8x1024xf32>
    %69 = arith.mulf %66, %68 : vector<8x1024xf32>
    %cst_31 = arith.constant dense<0.000000e+00> : vector<8xf32>
    %70 = vector.multi_reduction <add>, %69, %cst_31 [1] : vector<8x1024xf32> to vector<8xf32>
    %71 = vector.shape_cast %70 : vector<8xf32> to vector<8x1xf32>
    %cst_32 = arith.constant 1.024000e+03 : f32
    %72 = vector.broadcast %cst_32 : f32 to vector<8x1xf32>
    %73 = arith.divf %71, %72 : vector<8x1xf32>
    %cst_33 = arith.constant 9.99999974E-6 : f32
    %74 = vector.broadcast %cst_33 : f32 to vector<8x1xf32>
    %75 = arith.addf %73, %74 : vector<8x1xf32>
    %76 = math.rsqrt %75 : vector<8x1xf32>
    %c0_34 = arith.constant 0 : index
    %c0_35 = arith.constant 0 : index
    %77 = vector.load %arg3[%c0_34, %c0_35] : memref<8x1xf32, #tpu.memory_space<vmem>>, vector<8x1xf32>
    %78 = arith.mulf %76, %77 : vector<8x1xf32>
    %c0_36 = arith.constant 0 : index
    %c0_37 = arith.constant 0 : index
    %79 = vector.load %arg4[%c0_36, %c0_37] : memref<8x1xf32, #tpu.memory_space<vmem>>, vector<8x1xf32>
    %80 = arith.mulf %64, %78 : vector<8x1xf32>
    %81 = arith.subf %79, %80 : vector<8x1xf32>
    %82 = vector.broadcast %78 : vector<8x1xf32> to vector<8x1024xf32>
    %83 = arith.mulf %60, %82 : vector<8x1024xf32>
    %84 = vector.broadcast %81 : vector<8x1xf32> to vector<8x1024xf32>
    %85 = arith.addf %83, %84 : vector<8x1024xf32>
    %cst_38 = arith.constant 0.000000e+00 : f32
    %86 = vector.broadcast %cst_38 : f32 to vector<8x1024xf32>
    %87 = arith.maximumf %85, %86 : vector<8x1024xf32>
    %c0_39 = arith.constant 0 : index
    %c0_40 = arith.constant 0 : index
    %c0_41 = arith.constant 0 : index
    %88 = vector.load %arg5[%c0_39, %c0_40, %c0_41] : memref<1x8x1024xf32, #tpu.memory_space<vmem>>, vector<1x8x1024xf32>
    %89 = vector.shape_cast %88 : vector<1x8x1024xf32> to vector<8x1024xf32>
    %90 = vector.shape_cast %87 : vector<8x1024xf32> to vector<1x8x1024xf32>
    tpu.vector_store %arg5[%c0_39, %c0_40, %c0_41], %90 {strides = array<i32>} : memref<1x8x1024xf32, #tpu.memory_space<vmem>>, vector<1x8x1024xf32>,
    return
  }
  func.func @transform_0(%arg0: i32) -> (i32, i32, i32) {
    %c0_i32 = arith.constant 0 : i32
    %c0_i32_0 = arith.constant 0 : i32
    %c0_i32_1 = arith.constant 0 : i32
    return %arg0, %c0_i32, %c0_i32_0 : i32, i32, i32
  }
  func.func @transform_1(%arg0: i32) -> (i32, i32, i32) {
    %c0_i32 = arith.constant 0 : i32
    %c0_i32_0 = arith.constant 0 : i32
    %c0_i32_1 = arith.constant 0 : i32
    %c0_i32_2 = arith.constant 0 : i32
    return %c0_i32, %c0_i32_0, %c0_i32_1 : i32, i32, i32
  }
  func.func @transform_2(%arg0: i32) -> (i32, i32) {
    %c0_i32 = arith.constant 0 : i32
    %c0_i32_0 = arith.constant 0 : i32
    %c0_i32_1 = arith.constant 0 : i32
    return %c0_i32, %c0_i32_0 : i32, i32
  }
  func.func @transform_3(%arg0: i32) -> (i32, i32) {
    %c0_i32 = arith.constant 0 : i32
    %c0_i32_0 = arith.constant 0 : i32
    %c0_i32_1 = arith.constant 0 : i32
    return %c0_i32, %c0_i32_0 : i32, i32
  }
  func.func @transform_4(%arg0: i32) -> (i32, i32, i32) {
    %c0_i32 = arith.constant 0 : i32
    %c0_i32_0 = arith.constant 0 : i32
    %c0_i32_1 = arith.constant 0 : i32
    return %arg0, %c0_i32, %c0_i32_0 : i32, i32, i32
  }
}

</mosaic_0001>

<bundles_post_ra>
// kernel: tpu_custom_call.1
= control target key start
LH: loop header
LB: loop body
LE: loop exit
PB: predicated region body
PF: predicated region fallthrough
CT: control target
= control target key end

     0   :  { %9 = vsyncpa [#allocation3], 0  ;;  %s1256_s0 = inlined_call_operand.vmem [shape: bf16[2,12,544], index: 0, kind: input, shape index: {}]   ;;  %s1257_s1 = inlined_call_operand.vmem [shape: bf16[2,8,24], index: 1, kind: input, shape index: {}]   ;;  %s1258_s2 = inlined_call_operand.vmem [shape: f32[8,1], index: 2, kind: input, shape index: {}]   ;;  %s1259_s3 = inlined_call_operand.vmem [shape: f32[8,1], index: 3, kind: input, shape index: {}]   ;;  %s1260_s4 = inlined_call_operand.hbm [shape: f32[2,8,1024], index: 4, kind: output, shape index: {}]  }
   0x1   :  { %11 = vsyncpa [#allocation3 + $0x1], 0  ;;  %s967_s15 = smov 0   ;;  %s969_s16 = smov 0  }
   0x2   :  { %s971_s17 = smov 0   ;;  %s973_s18 = smov 0  }
   0x3 LB: > { %s988_s19 = sadd.s32 4294967295, %s935_s18   ;;  %s801_s20 = sadd.s32 4294967294, %s935_s18   ;;  %s935_s18 = sphi %s973_s18, %s1266_s18   ;;  %s931_s17 = sphi %s971_s17, %s1265_s17   ;;  %s927_s16 = sphi %s969_s16, %s1264_s16   ;;  %s923_s15 = sphi %s967_s15, %s1263_s15  }
   0x4   : > { %s992_s21 = sadd.s32 1, %s935_s18   ;;  %s113_s22 = sadd.s32 1, %s931_s17 }
   0x5   : > { %s110_s23 = ssub.s32 %s935_s18, %s992_s21  ;;  %p123_p0 = scmp.ne.s32.totalorder %s931_s17, %s927_s16 }
   0x6   : > { %p111_p1 = scmp.eq.s32.totalorder %s110_s23, 0  ;;  %p124_p2 = scmp.eq.s32.totalorder %s988_s19, 1 }
   0x7   : > { %p129_p3 = scmp.ne.s32.totalorder %s927_s16, %s923_s15  ;;  %p130_p4 = scmp.eq.s32.totalorder %s801_s20, 1 }
   0x8   : > { %s1003_s24 = scalar_select %p111_p1, %s931_s17, %s113_s22  }
   0x9   : > { %p1005_p5 = por %p124_p2, %p123_p0  ;;  %p1009_p6 = por %p130_p4, %p129_p3 }
   0xa   : > { %p804_p7 = scmp.ge.s32.totalorder %s935_s18, 1  ;;  %p165_p8 = scmp.lt.s32.totalorder %s935_s18, 3 }
   0xc   : > { %p166_p9 = pnand %p804_p7, %p165_p8 }
   0xd   : > { %p191_p10 = scmp.lt.s32.totalorder (!%p166_p9), %s988_s19, 1  ;;  %s937_s6 = smov (!%p166_p9), 96  }
   0xe   : > { %169 = sbr.rel (%p166_p9) target bundleno = 843 (0x34b), region = 36  ;;  %s938_s11 = smov (!%p166_p9), 64  }
   0xf   : > { %s939_s12 = smov (!%p166_p9), 32   ;;  %s188_s23 = sand.u32 (!%p166_p9), 1, %s927_s16  }
  0x10   : > { %s726_s8 = scalar_lea.sflag (!%p166_p9), [#allocation3], %s188_s23  ;;  %s893_s13 = scalar_lea.hbm (!%p166_p9), %s1260_s4, 128 }
  0x13   : > { %s192_s27 = scalar_select %p191_p10, %s988_s19, 1  ;;  %vm234_vm0 = vcmask 1041408   ;;  %vm247_vm1 = vcmask 1043456   ;;  %vm260_vm2 = vcmask 1045504   ;;  %vm256_vm3 = vcmask 97280  }
  0x14   : > { %vm360_vm4 = vcmask 785408   ;;  %vm453_vm5 = vcmask 195584   ;;  %vm557_vm6 = vcmask 261120   ;;  %vm559_vm7 = vcmask 523264  }
  0x15   : > { %s822_s28 = smul.u32 40, %s192_s27  ;;  %s805_s27 = sshll.u32 %s188_s23, 6 }
  0x17   : > { %s1020_s5 = scalar_lea.vmem %s1256_s0, %s822_s28  ;;  %s821_s28 = sshll.u32 %s988_s19, 6 }
  0x18   : > { %v327_v0 = vld [vmem:[%s1020_s5 + $0x8] sm:$0xcc]  ;;  %v326_v1 = vld [vmem:[%s1020_s5] sm:$0xcc]  ;;  %v329_v2 = vld [vmem:[%s1020_s5 + $0x14] sm:$0x33] }
  0x19   : > { %v370_v3 = vunpack.c.l.b16 %v327_v0  ;;  %v368_v4 = vunpack.c.l.b16 %v326_v1  ;;  %v400_v5 = vunpack.c.l.b16 %v329_v2  ;;  %v371_v6 = vunpack.c.h.b16 %v327_v0  ;;  %v330_v17 = vld [vmem:[%s1020_s5 + $0x1c] sm:$0x33]  ;;  %v328_v19 = vld [vmem:[%s1020_s5 + $0x10] sm:$0xc]  ;;  %v331_v28 = vld [vmem:[%s1020_s5 + $0x24] sm:$0x3] }
  0x1a   : > { %v369_v8 = vunpack.c.h.b16 %v326_v1  ;;  %v401_v10 = vunpack.c.h.b16 %v329_v2  ;;  %v403_v22 = vunpack.c.h.b16 %v330_v17  ;;  %v402_v23 = vunpack.c.l.b16 %v330_v17  ;;  %v323_v29 = vld [vmem:[%s1020_s5] sm:$0x33]  ;;  %v324_v39 = vld [vmem:[%s1020_s5 + $0x8] sm:$0x33]  ;;  %v325_v41 = vld [vmem:[%s1020_s5 + $0x10] sm:$0x3] }
  0x1b   : > { %v375_v7 = vpack.c.b16 %v370_v3, %v370_v3  ;;  %v373_v9 = vpack.c.b16 %v368_v4, %v368_v4  ;;  %v405_v11 = vpack.c.b16 %v400_v5, %v400_v5  ;;  %v376_v15 = vpack.c.b16 %v371_v6, %v371_v6  ;;  %v198_v54 = vld [vmem:[%s1020_s5] sm:$0x33]  ;;  %v200_v55 = vld [vmem:[%s1020_s5] sm:$0xcc]  ;;  %v202_v56 = vld [vmem:[%s1020_s5 + $0x14] sm:$0x33] }
  0x1c   : > { %v374_v16 = vpack.c.b16 %v369_v8, %v369_v8  ;;  %v406_v18 = vpack.c.b16 %v401_v10, %v401_v10  ;;  %v372_v25 = vunpack.c.l.b16 %v328_v19  ;;  %v408_v26 = vpack.c.b16 %v403_v22, %v403_v22  ;;  %v197_v2 = vld [vmem:[%s1257_s1] sm:$0xf]  ;;  %v199_v6 = vld [vmem:[%s1020_s5 + $0x8] sm:$0x33] }
  0x1d   : > { %v380_v12 = vrot.slane %v375_v7, 2  ;;  %v378_v13 = vrot.slane %v373_v9, 2  ;;  %v410_v14 = vrot.slane %v405_v11, 6  ;;  %v381_v20 = vrot.slane %v376_v15, 2  ;;  %v201_v7 = vld [vmem:[%s1020_s5 + $0x8] sm:$0xcc] }
  0x1e   : > { %v379_v21 = vrot.slane %v374_v16, 2  ;;  %v411_v24 = vrot.slane %v406_v18, 6  ;;  %v407_v27 = vpack.c.b16 %v402_v23, %v402_v23  ;;  %v377_v30 = vpack.c.b16 %v372_v25, %v372_v25  ;;  %v203_v10 = vld [vmem:[%s1020_s5 + $0x1c] sm:$0x33]  ;;  %s737_s5 = scalar_lea.hbm %s1260_s4, %s821_s28 }
  0x1f   : > { %387 = vrot.lane.b32.xlu1 %v380_v12, %s937_s6  ;;  %383 = vrot.lane.b32.xlu0 %v378_v13, %s937_s6  ;;  %v413_v31 = vrot.slane %v408_v26, 6  ;;  %v404_v33 = vunpack.c.l.b16 %v331_v28  ;;  %v335_v34 = vunpack.c.l.b16 %v323_v29  ;;  %v336_v36 = vunpack.c.h.b16 %v323_v29  ;;  %s741_s7 = sshll.u32 %s737_s5, 4  ;;  %s742_s7 = int_to_ptr.hbm [resolvable:$true] %s741_s7 }
  0x20   : > { %415 = vrot.lane.b32.xlu2 %v410_v14, %s937_s6  ;;  %v412_v32 = vrot.slane %v407_v27, 6  ;;  %v382_v35 = vrot.slane %v377_v30, 2  ;;  %v337_v44 = vunpack.c.l.b16 %v324_v39  ;;  %v338_v45 = vunpack.c.h.b16 %v324_v39  ;;  %s887_s9 = sshra.s32 %s742_s7, 4  ;;  %s888_s9 = int_to_ptr.hbm [resolvable:$true] %s887_s9 }
  0x21   : > { %v409_v37 = vpack.c.b16 %v404_v33, %v404_v33  ;;  %v340_v38 = vpack.c.b16 %v335_v34, %v335_v34  ;;  %v341_v40 = vpack.c.b16 %v336_v36, %v336_v36  ;;  %v339_v47 = vunpack.c.l.b16 %v325_v41  ;;  %s889_s10 = scalar_lea.hbm %s888_s9, 64  ;;  %p894_p0 = scmp.lt.s32.totalorder %s888_s9, %s1260_s4 }
  0x22   : > { %v342_v48 = vpack.c.b16 %v337_v44, %v337_v44  ;;  %v343_v49 = vpack.c.b16 %v338_v45, %v338_v45  ;;  %v206_v57 = vunpack.c.l.b16 %v198_v54  ;;  %v216_v58 = vunpack.c.l.b16 %v200_v55  ;;  %p890_p11 = scmp.ne.s32.totalorder %s888_s9, %s889_s10  ;;  %p895_p1 = scmp.lt.s32.totalorder %s893_s13, %s889_s10 }
  0x23   : > { %v414_v42 = vrot.slane %v409_v37, 6  ;;  %v345_v43 = vrot.slane %v340_v38, 2  ;;  %v346_v46 = vrot.slane %v341_v40, 2  ;;  %v344_v50 = vpack.c.b16 %v339_v47, %v339_v47 }
  0x24   : > { %v347_v51 = vrot.slane %v342_v48, 2  ;;  %v348_v52 = vrot.slane %v343_v49, 2  ;;  %v226_v59 = vunpack.c.l.b16 %v202_v56  ;;  %v210_v60 = vpack.c.b16 %v206_v57, %v206_v57  ;;  %p891_p12 = pnand %p890_p11, %p1005_p5  ;;  %p896_p2 = por %p895_p1, %p894_p0 }
  0x25   : > { %v349_v53 = vrot.slane %v344_v50, 2  ;;  %v220_v61 = vpack.c.b16 %v216_v58, %v216_v58  ;;  %v207_v3 = vunpack.c.h.b16 %v198_v54  ;;  %v217_v4 = vunpack.c.h.b16 %v200_v55 }
  0x26   : > { %v230_v62 = vpack.c.b16 %v226_v59, %v226_v59  ;;  %v227_v5 = vunpack.c.h.b16 %v202_v56  ;;  %v208_v11 = vunpack.c.l.b16 %v199_v6  ;;  %v218_v12 = vunpack.c.l.b16 %v201_v7  ;;  %p892_p13 = pneg %p891_p12 }
  0x27   : > { %389 = vrot.lane.b32.xlu1 %v381_v20, %s937_s6  ;;  %385 = vrot.lane.b32.xlu0 %v379_v21, %s937_s6  ;;  %v237_v63 = vsel %vm234_vm0, %v210_v60, %v220_v61  ;;  %v211_v8 = vpack.c.b16 %v207_v3, %v207_v3  ;;  %v221_v9 = vpack.c.b16 %v217_v4, %v217_v4  ;;  %v228_v14 = vunpack.c.l.b16 %v203_v10 }
  0x28   : > { %417 = vrot.lane.b32.xlu2 %v411_v24, %s937_s6  ;;  %v1051_v0 = vsel %vm247_vm1, %v237_v63, %v230_v62  ;;  %v231_v13 = vpack.c.b16 %v227_v5, %v227_v5  ;;  %v212_v16 = vpack.c.b16 %v208_v11, %v208_v11  ;;  %v222_v17 = vpack.c.b16 %v218_v12, %v218_v12  ;;  %v811_v63 = vld [vmem:[%s1257_s1 + $0x4] sm:$0xf]  ;;  %p897_p3 = pnand %p896_p2, %p892_p13 }
  0x29   : > { %v261_v1 = vsel %vm260_vm2, %v1051_v0, 0  ;;  %v240_v15 = vsel %vm234_vm0, %v211_v8, %v221_v9  ;;  %v232_v19 = vpack.c.b16 %v228_v14, %v228_v14  ;;  %v209_v24 = vunpack.c.h.b16 %v199_v6 }
  0x2a   : > { %276 = vmatpush.bf16.msra.mxu0 %v261_v1  ;;  %v1064_v18 = vsel %vm247_vm1, %v240_v15, %v231_v13  ;;  %v243_v21 = vsel %vm234_vm0, %v212_v16, %v222_v17  ;;  %v219_v25 = vunpack.c.h.b16 %v201_v7  ;;  %v229_v26 = vunpack.c.h.b16 %v203_v10 }
  0x2b   : > { %v263_v20 = vsel %vm260_vm2, %v1064_v18, 0  ;;  %v1070_v22 = vsel %vm247_vm1, %v243_v21, %v232_v19  ;;  %v213_v27 = vpack.c.b16 %v209_v24, %v209_v24 }
  0x2c   : > { %289 = vmatpush.bf16.msra.mxu1 %v263_v20  ;;  %v265_v23 = vsel %vm260_vm2, %v1070_v22, 0  ;;  %v223_v28 = vpack.c.b16 %v219_v25, %v219_v25  ;;  %v233_v29 = vpack.c.b16 %v229_v26, %v229_v26 }
  0x2d   : > { %807 = vmatmul.msk.bf16.vlgmr.msra.gmra.mxu0 %vm256_vm3, %v197_v2  ;;  %302 = vmatpush.bf16.msra.mxu2 %v265_v23 }
  0x2e   : > { %v246_v30 = vsel %vm234_vm0, %v213_v27, %v223_v28 }
  0x2f   : > { %421 = vrot.lane.b32.xlu1 %v413_v31, %s937_s6  ;;  %419 = vrot.lane.b32.xlu0 %v412_v32, %s937_s6  ;;  %v255_v31 = vsel %vm247_vm1, %v246_v30, %v233_v29 }
  0x30   : > { %391 = vrot.lane.b32.xlu2 %v382_v35, %s937_s6  ;;  %808 = vmatmul.msk.bf16.vlgmr.msra.gmra.mxu1 %vm256_vm3, %v197_v2  ;;  %v267_v32 = vsel %vm260_vm2, %v255_v31, 0 }
  0x31   : > { %809 = vmatmul.msk.bf16.vlgmr.msra.gmra.mxu2 %vm256_vm3, %v197_v2  ;;  %315 = vmatpush.bf16.msra.mxu3 %v267_v32 }
  0x34   : > { %810 = vmatmul.msk.bf16.vlgmr.msra.gmra.mxu3 %vm256_vm3, %v197_v2 }
  0x37   : > { %423 = vrot.lane.b32.xlu0 %v414_v42, %s937_s6  ;;  %350 = vrot.lane.b32.xlu1 %v345_v43, %s937_s6 }
  0x38   : > { %352 = vrot.lane.b32.xlu2 %v346_v46, %s937_s6 }
  0x3f   : > { %354 = vrot.lane.b32.xlu0 %v347_v51, %s937_s6  ;;  %356 = vrot.lane.b32.xlu1 %v348_v52, %s937_s6 }
  0x40   : > { %358 = vrot.lane.b32.xlu2 %v349_v53, %s937_s6 }
  0x7a   : > { %v416_v33 = vpop.permute.xlu2 %415 }
  0x82   : > { %v418_v36 = vpop.permute.xlu2 %417 }
  0x83   : > { %v425_v39 = vsel %vm360_vm4, %v416_v33, %v418_v36 }
  0x8a   : > { %v392_v43 = vpop.permute.xlu2 %391 }
  0x91   : > { %v388_v34 = vpop.permute.xlu1 %387  ;;  %v384_v35 = vpop.permute.xlu0 %383 }
  0x92   : > { %v353_v54 = vpop.permute.xlu2 %352 }
  0x99   : > { %v390_v37 = vpop.permute.xlu1 %389  ;;  %v386_v38 = vpop.permute.xlu0 %385 }
  0x9a   : > { %v393_v40 = vsel %vm360_vm4, %v384_v35, %v386_v38  ;;  %v395_v46 = vsel %vm360_vm4, %v388_v34, %v390_v37  ;;  %v394_v47 = vsel %vm360_vm4, %v386_v38, %v388_v34  ;;  %v396_v57 = vsel %vm360_vm4, %v390_v37, %v392_v43  ;;  %v359_v1 = vpop.permute.xlu2 %358 }
  0x9b   : > { %v443_v41 = vsel %vm234_vm0, %v393_v40, %v425_v39 }
  0x9c   : > { %v457_v42 = vsel %vm247_vm1, %v443_v41, 0 }
  0x9d   : > { %471 = vmatpush.bf16.msrb.mxu0 %v457_v42 }
  0xa1   : > { %v422_v44 = vpop.permute.xlu1 %421  ;;  %v420_v45 = vpop.permute.xlu0 %419 }
  0xa2   : > { %v426_v48 = vsel %vm360_vm4, %v418_v36, %v420_v45  ;;  %v427_v49 = vsel %vm360_vm4, %v420_v45, %v422_v44 }
  0xa3   : > { %v446_v50 = vsel %vm234_vm0, %v394_v47, %v426_v48  ;;  %v449_v51 = vsel %vm234_vm0, %v395_v46, %v427_v49 }
  0xa4   : > { %v459_v52 = vsel %vm247_vm1, %v446_v50, 0  ;;  %v461_v53 = vsel %vm247_vm1, %v449_v51, 0 }
  0xa5   : > { %484 = vmatpush.bf16.msrb.mxu1 %v459_v52  ;;  %497 = vmatpush.bf16.msrb.mxu2 %v461_v53 }
  0xa9   : > { %v424_v55 = vpop.permute.xlu0 %423  ;;  %v351_v56 = vpop.permute.xlu1 %350 }
  0xaa   : > { %v428_v58 = vsel %vm360_vm4, %v422_v44, %v424_v55  ;;  %v361_v59 = vsel %vm360_vm4, %v351_v56, %v353_v54  ;;  %v278_v9 = vpop.f32.mrf.mxu0 }
  0xab   : > { %v430_v60 = vsel %vm260_vm2, %v1051_v0, %v361_v59  ;;  %v452_v61 = vsel %vm234_vm0, %v396_v57, %v428_v58  ;;  %528 = vrot.lane.b32.xlu1 %v278_v9, %s938_s11  ;;  %522 = vrot.lane.b32.xlu0 %v278_v9, %s939_s12 }
  0xac   : > { %472 = vmatpush.bf16.msrb.mxu0 %v430_v60  ;;  %v463_v62 = vsel %vm247_vm1, %v452_v61, 0 }
  0xad   : > { %510 = vmatpush.bf16.msrb.mxu3 %v463_v62  ;;  %v291_v11 = vpop.f32.mrf.mxu1 }
  0xae   : > { %554 = vrot.lane.b32.xlu2 %v291_v11, %s937_s6 }
  0xaf   : > { %812 = vmatmul.msk.bf16.vlgmr.msrb.gmra.mxu0 %vm453_vm5, %v811_v63 }
  0xb1   : > { %v355_v2 = vpop.permute.xlu0 %354  ;;  %v357_v3 = vpop.permute.xlu1 %356 }
  0xb2   : > { %v362_v4 = vsel %vm360_vm4, %v353_v54, %v355_v2  ;;  %v363_v0 = vsel %vm360_vm4, %v355_v2, %v357_v3  ;;  %v364_v5 = vsel %vm360_vm4, %v357_v3, %v359_v1  ;;  %v280_v10 = vpop.f32.mrf.mxu0 }
  0xb3   : > { %v433_v6 = vsel %vm260_vm2, %v1064_v18, %v362_v4  ;;  %v436_v7 = vsel %vm260_vm2, %v1070_v22, %v363_v0  ;;  %v439_v8 = vsel %vm260_vm2, %v255_v31, %v364_v5  ;;  %534 = vrot.lane.b32.xlu1 %v278_v9, %s937_s6  ;;  %548 = vrot.lane.b32.xlu0 %v291_v11, %s938_s11 }
  0xb4   : > { %485 = vmatpush.bf16.msrb.mxu1 %v433_v6  ;;  %498 = vmatpush.bf16.msrb.mxu2 %v436_v7  ;;  %v304_v13 = vpop.f32.mrf.mxu2 }
  0xb5   : > { %511 = vmatpush.bf16.msrb.mxu3 %v439_v8  ;;  %v293_v12 = vpop.f32.mrf.mxu1 }
  0xb6   : > { %589 = vrot.lane.b32.xlu2 %v304_v13, %s937_s6 }
  0xb7   : > { %813 = vmatmul.msk.bf16.vlgmr.msrb.gmra.mxu1 %vm453_vm5, %v811_v63  ;;  %814 = vmatmul.msk.bf16.vlgmr.msrb.gmra.mxu2 %vm453_vm5, %v811_v63  ;;  %v1123_v15 = vpop.f32.mrf.mxu3 }
  0xb8   : > { %815 = vmatmul.msk.bf16.vlgmr.msrb.gmra.mxu3 %vm453_vm5, %v811_v63 }
  0xbb   : > { %542 = vrot.lane.b32.xlu1 %v291_v11, %s939_s12  ;;  %583 = vrot.lane.b32.xlu0 %v304_v13, %s938_s11 }
  0xbc   : > { %v306_v14 = vpop.f32.mrf.mxu2 }
  0xbf   : > { %v319_v16 = vpop.f32.mrf.mxu3 }
  0xc0   : > { %v940_v16 = vmov 1024.0  }
  0xc1   : > { %869 = vrcp.f32 %v940_v16 }
  0xc3   : > { %577 = vrot.lane.b32.xlu1 %v304_v13, %s939_s12 }
  0xcb   : > { %597 = vrot.lane.b32.xlu1 %v1123_v15, %s939_s12 }
 0x108   : > { %v555_v26 = vpop.permute.xlu2 %554 }
 0x110   : > { %v590_v29 = vpop.permute.xlu2 %589 }
 0x11d   : > { %v529_v25 = vpop.permute.xlu1 %528  ;;  %v523_v27 = vpop.permute.xlu0 %522 }
 0x125   : > { %v535_v28 = vpop.permute.xlu1 %534  ;;  %v549_v30 = vpop.permute.xlu0 %548 }
 0x12c   : > { %v474_v17 = vpop.f32.mrf.mxu0 }
 0x12d   : > { %531 = vrot.lane.b32.xlu2 %v474_v17, %s937_s6  ;;  %518 = vrot.lane.b32.xlu0 %v474_v17, %s939_s12  ;;  %v543_v31 = vpop.permute.xlu1 %542  ;;  %v584_v33 = vpop.permute.xlu0 %583 }
 0x134   : > { %v476_v18 = vpop.f32.mrf.mxu0  ;;  %v487_v19 = vpop.f32.mrf.mxu1 }
 0x135   : > { %551 = vrot.lane.b32.xlu1 %v487_v19, %s937_s6  ;;  %525 = vrot.lane.b32.xlu2 %v474_v17, %s938_s11  ;;  %v578_v34 = vpop.permute.xlu1 %577 }
 0x136   : > { %538 = vrot.lane.b32.xlu0 %v487_v19, %s939_s12 }
 0x13a   : > { %v500_v20 = vpop.f32.mrf.mxu2 }
 0x13b   : > { %v1132_v21 = vpop.f32.mrf.mxu3 }
 0x13c   : > { %v489_v22 = vpop.f32.mrf.mxu1 }
 0x13d   : > { %586 = vrot.lane.b32.xlu1 %v500_v20, %s937_s6  ;;  %545 = vrot.lane.b32.xlu2 %v487_v19, %s938_s11  ;;  %v598_v37 = vpop.permute.xlu1 %597 }
 0x13e   : > { %573 = vrot.lane.b32.xlu0 %v500_v20, %s939_s12 }
 0x142   : > { %v502_v23 = vpop.f32.mrf.mxu2 }
 0x143   : > { %v515_v24 = vpop.f32.mrf.mxu3 }
 0x145   : > { %580 = vrot.lane.b32.xlu2 %v500_v20, %s938_s11  ;;  %606 = vrot.lane.b32.xlu1 %v1132_v21, %s937_s6 }
 0x146   : > { %593 = vrot.lane.b32.xlu0 %v1132_v21, %s939_s12 }
 0x14d   : > { %600 = vrot.lane.b32.xlu2 %v1132_v21, %s938_s11 }
 0x14e   : > { %603 = vrot.lane.b32.xlu0 %v1123_v15, %s938_s11 }
 0x155   : > { %609 = vrot.lane.b32.xlu2 %v1123_v15, %s937_s6  ;;  %s190_s6 = scalar_lea.vmem [#allocation2], %s805_s27 }
 0x156   : > { %s739_s19 = sshll.u32 %s190_s6, 4  ;;  %s740_s19 = int_to_ptr.vmem [resolvable:$true] %s739_s19 }
 0x187   : > { %v532_v32 = vpop.permute.xlu2 %531 }
 0x188   : > { %v563_v42 = vsel %vm557_vm6, %v529_v25, %v532_v32 }
 0x189   : > { %v564_v46 = vsel %vm559_vm7, %v563_v42, %v535_v28 }
 0x18a   : > { %v1158_v50 = vsel %vm360_vm4, %v564_v46, %v474_v17  ;;  %v870_v17 = vpop.eup %869 }
 0x18b   : > { %v634_v18 = vmul.f32 1024.0, %v870_v17  ;;  %vm638_vm8 = vweird.f32 %v870_v17 }
 0x18f   : > { %v526_v35 = vpop.permute.xlu2 %525 }
 0x197   : > { %v546_v38 = vpop.permute.xlu2 %545 }
 0x19f   : > { %v519_v36 = vpop.permute.xlu0 %518  ;;  %v581_v43 = vpop.permute.xlu2 %580 }
 0x1a0   : > { %v558_v40 = vsel %vm557_vm6, %v278_v9, %v519_v36 }
 0x1a1   : > { %v560_v45 = vsel %vm559_vm7, %v558_v40, %v523_v27 }
 0x1a2   : > { %v1155_v49 = vsel %vm360_vm4, %v560_v45, %v526_v35 }
 0x1a3   : > { %v624_v54 = vadd.f32 %v1158_v50, %v1155_v49 }
 0x1a7   : > { %v552_v41 = vpop.permute.xlu1 %551  ;;  %v601_v59 = vpop.permute.xlu2 %600 }
 0x1a8   : > { %v539_v39 = vpop.permute.xlu0 %538  ;;  %v569_v51 = vsel %vm557_vm6, %v549_v30, %v552_v41 }
 0x1a9   : > { %v566_v44 = vsel %vm557_vm6, %v291_v11, %v539_v39  ;;  %v570_v55 = vsel %vm559_vm7, %v569_v51, %v555_v26 }
 0x1aa   : > { %v567_v47 = vsel %vm559_vm7, %v566_v44, %v543_v31  ;;  %v1171_v61 = vsel %vm360_vm4, %v570_v55, %v487_v19  ;;  %v635_v19 = vsub.f32 1.0, %v634_v18 }
 0x1ab   : > { %v1162_v52 = vsel %vm360_vm4, %v567_v47, %v546_v38 }
 0x1ac   : > { %v625_v56 = vadd.f32 %v624_v54, %v1162_v52 }
 0x1ae   : > { %v626_v2 = vadd.f32 %v625_v56, %v1171_v61 }
 0x1af   : > { %v587_v57 = vpop.permute.xlu1 %586  ;;  %v610_v10 = vpop.permute.xlu2 %609 }
 0x1b0   : > { %v574_v48 = vpop.permute.xlu0 %573  ;;  %v615_v62 = vsel %vm557_vm6, %v584_v33, %v587_v57 }
 0x1b1   : > { %v612_v53 = vsel %vm557_vm6, %v304_v13, %v574_v48  ;;  %v616_v3 = vsel %vm559_vm7, %v615_v62, %v590_v29  ;;  %v941_v48 = vmov 0   ;;  %v678_v62 = vld [vmem:[%s1258_s2] sm:$0xff] }
 0x1b2   : > { %v613_v58 = vsel %vm559_vm7, %v612_v53, %v578_v34  ;;  %v1184_v5 = vsel %vm360_vm4, %v616_v3, %v500_v20  ;;  %v636_v20 = vmul.f32 %v870_v17, %v635_v19  ;;  %867 = vset.pattern.permute.xlu2 %v941_v48  ;;  %868 = vset.pattern.permute.xlu0 %v941_v48 }
 0x1b3   : > { %v1175_v63 = vsel %vm360_vm4, %v613_v58, %v581_v43 }
 0x1b4   : > { %v627_v0 = vadd.f32 %v626_v2, %v1175_v63  ;;  %v637_v22 = vadd.f32 %v870_v17, %v636_v20 }
 0x1b6   : > { %v628_v9 = vadd.f32 %v627_v0, %v1184_v5  ;;  %v639_v23 = vsel %vm638_vm8, %v870_v17, %v637_v22 }
 0x1b7   : > { %v607_v7 = vpop.permute.xlu1 %606 }
 0x1b8   : > { %v594_v60 = vpop.permute.xlu0 %593 }
 0x1b9   : > { %v618_v1 = vsel %vm557_vm6, %v1123_v15, %v594_v60 }
 0x1ba   : > { %v619_v4 = vsel %vm559_vm7, %v618_v1, %v598_v37 }
 0x1bb   : > { %v1187_v6 = vsel %vm360_vm4, %v619_v4, %v601_v59  ;;  %v680_v4 = vld [vmem:[%s1259_s3] sm:$0xff] }
 0x1bc   : > { %v629_v13 = vadd.f32 %v628_v9, %v1187_v6 }
 0x1c0   : > { %v604_v8 = vpop.permute.xlu0 %603 }
 0x1c1   : > { %v621_v11 = vsel %vm557_vm6, %v604_v8, %v607_v7 }
 0x1c2   : > { %v622_v12 = vsel %vm559_vm7, %v621_v11, %v610_v10 }
 0x1c3   : > { %v1195_v14 = vsel %vm360_vm4, %v622_v12, %v1132_v21 }
 0x1c4   : > { %v630_v15 = vadd.f32 %v629_v13, %v1195_v14 }
 0x1c6   : > { %631 = vadd.xlane.f32.xlu0 %v630_v15 }
 0x239   : > { %v632_v24 = vpop.xlane.xlu0 %631 }
 0x23a   : > { %v640_v25 = vmul.f32 %v639_v23, %v632_v24 }
 0x23c   : > { %v641_v26 = vsub.f32 %v1155_v49, %v640_v25  ;;  %v642_v27 = vsub.f32 %v1158_v50, %v640_v25  ;;  %v643_v21 = vsub.f32 %v1162_v52, %v640_v25  ;;  %v644_v28 = vsub.f32 %v1171_v61, %v640_v25 }
 0x23d   : > { %v645_v31 = vsub.f32 %v1175_v63, %v640_v25  ;;  %v646_v34 = vsub.f32 %v1184_v5, %v640_v25  ;;  %v647_v37 = vsub.f32 %v1187_v6, %v640_v25  ;;  %v648_v40 = vsub.f32 %v1195_v14, %v640_v25 }
 0x23e   : > { %v649_v29 = vmul.f32 %v641_v26, %v641_v26  ;;  %v650_v30 = vmul.f32 %v642_v27, %v642_v27  ;;  %v651_v32 = vmul.f32 %v643_v21, %v643_v21  ;;  %v652_v35 = vmul.f32 %v644_v28, %v644_v28 }
 0x23f   : > { %v653_v38 = vmul.f32 %v645_v31, %v645_v31  ;;  %v654_v41 = vmul.f32 %v646_v34, %v646_v34  ;;  %v655_v43 = vmul.f32 %v647_v37, %v647_v37  ;;  %v656_v45 = vmul.f32 %v648_v40, %v648_v40 }
 0x240   : > { %v657_v33 = vadd.f32 %v650_v30, %v649_v29 }
 0x242   : > { %v658_v36 = vadd.f32 %v657_v33, %v651_v32 }
 0x244   : > { %v659_v39 = vadd.f32 %v658_v36, %v652_v35 }
 0x246   : > { %v660_v42 = vadd.f32 %v659_v39, %v653_v38 }
 0x248   : > { %v661_v44 = vadd.f32 %v660_v42, %v654_v41 }
 0x24a   : > { %v662_v46 = vadd.f32 %v661_v44, %v655_v43 }
 0x24c   : > { %v663_v47 = vadd.f32 %v662_v46, %v656_v45 }
 0x24e   : > { %664 = vadd.xlane.f32.xlu1 %v663_v47 }
 0x2c1   : > { %v665_v51 = vpop.xlane.xlu1 %664 }
 0x2c2   : > { %v666_v53 = vmul.f32 %v665_v51, %v639_v23 }
 0x2c4   : > { %v667_v54 = vadd.f32 1e-05, %v666_v53 }
 0x2c6   : > { %871 = vrsqrt.f32 %v667_v54  ;;  %vm674_vm10 = vweird.f32 %v667_v54 }
 0x2cc   : > { %v872_v55 = vpop.eup %871 }
 0x2cd   : > { %v669_v56 = vmul.f32 %v872_v55, %v667_v54  ;;  %vm675_vm9 = vweird.f32 %v872_v55 }
 0x2ce   : > { %vm676_vm11 = vmor %vm674_vm10, %vm675_vm9 }
 0x2cf   : > { %v670_v57 = vmul.f32 %v872_v55, %v669_v56 }
 0x2d1   : > { %v671_v58 = vmul.f32 0.5, %v670_v57 }
 0x2d3   : > { %v672_v59 = vsub.f32 1.5, %v671_v58 }
 0x2d5   : > { %v673_v60 = vmul.f32 %v872_v55, %v672_v59 }
 0x2d7   : > { %v677_v1 = vsel %vm676_vm11, %v872_v55, %v673_v60 }
 0x2d8   : > { %v679_v2 = vmul.f32 %v678_v62, %v677_v1 }
 0x2da   : > { %685 = vperm.xlu2 %867, %v679_v2   ;;  %v681_v3 = vmul.f32 %v679_v2, %v640_v25 }
 0x2dc   : > { %v682_v0 = vsub.f32 %v680_v4, %v681_v3 }
 0x2e2   : > { %698 = vperm.xlu2 %867, %v682_v0  }
 0x334   : > { %v686_v7 = vpop.permute.xlu2 %685 }
 0x335   : > { %v688_v8 = vmul.f32 %v686_v7, %v1155_v49  ;;  %v689_v9 = vmul.f32 %v686_v7, %v1158_v50  ;;  %v690_v10 = vmul.f32 %v686_v7, %v1162_v52  ;;  %v691_v11 = vmul.f32 %v686_v7, %v1171_v61 }
 0x336   : > { %v692_v12 = vmul.f32 %v686_v7, %v1175_v63  ;;  %v693_v13 = vmul.f32 %v686_v7, %v1184_v5  ;;  %v694_v15 = vmul.f32 %v686_v7, %v1187_v6  ;;  %v695_v49 = vmul.f32 %v686_v7, %v1195_v14 }
 0x33c   : > { %v699_v16 = vpop.permute.xlu2 %698 }
 0x33d   : > { %v701_v17 = vadd.f32 %v699_v16, %v688_v8  ;;  %v702_v18 = vadd.f32 %v699_v16, %v689_v9  ;;  %v703_v19 = vadd.f32 %v699_v16, %v690_v10  ;;  %v704_v20 = vadd.f32 %v699_v16, %v691_v11 }
 0x33e   : > { %v705_v50 = vadd.f32 %v699_v16, %v692_v12  ;;  %v706_v52 = vadd.f32 %v699_v16, %v693_v13  ;;  %v707_v22 = vadd.f32 %v699_v16, %v694_v15  ;;  %v708_v25 = vadd.f32 %v699_v16, %v695_v49 }
 0x33f   : > { %v709_v61 = vmax.f32 %v701_v17, 0.0  ;;  %v710_v23 = vmax.f32 %v702_v18, 0.0  ;;  %v711_v24 = vmax.f32 %v703_v19, 0.0  ;;  %v712_v63 = vmax.f32 %v704_v20, 0.0 }
 0x340   : > { %v713_v5 = vmax.f32 %v705_v50, 0.0  ;;  %v714_v6 = vmax.f32 %v706_v52, 0.0  ;;  %v715_v26 = vmax.f32 %v707_v22, 0.0  ;;  %v716_v14 = vmax.f32 %v708_v25, 0.0 }
 0x341   : > { %717 = vst [vmem:[%s190_s6] sm:$0xff] %v709_v61 }
 0x342   : > { %718 = vst [vmem:[%s190_s6 + $0x8] sm:$0xff] %v710_v23 }
 0x343   : > { %719 = vst [vmem:[%s190_s6 + $0x10] sm:$0xff] %v711_v24 }
 0x344   : > { %720 = vst [vmem:[%s190_s6 + $0x18] sm:$0xff] %v712_v63 }
 0x345   : > { %721 = vst [vmem:[%s190_s6 + $0x20] sm:$0xff] %v713_v5 }
 0x346   : > { %722 = vst [vmem:[%s190_s6 + $0x28] sm:$0xff] %v714_v6 }
 0x347   : > { %723 = vst [vmem:[%s190_s6 + $0x30] sm:$0xff] %v715_v26 }
 0x348   : > { %724 = vst [vmem:[%s190_s6 + $0x38] sm:$0xff] %v716_v14 }
 0x349   : > { %900 = shalt.err (!%p897_p3)
}
 0x34a   : > { %823 = dma.vmem_to_hbm [thread:$0]  (%p1005_p5), %s740_s19, 1024, %s742_s7, %s726_s8  }
 0x34b PF: > { %p829_p4 = scmp.ge.s32.totalorder %s935_s18, 2  ;;  %s753_s22 = sand.u32 1, %s923_s15  }
 0x34c   : > { %s754_s23 = scalar_lea.sflag [#allocation3], %s753_s22 }
 0x34d   : > { %p826_p7 = pnand %p829_p4, %p1009_p6 }
 0x34f   : > { %p827_p8 = pneg %p826_p7 }
 0x351   : > { %918 = dma.done.wait (%p827_p8), %s754_s23, 1024  }
 0x352   : > { %920 = vsyncadd (%p827_p8), %s754_s23, 4294966272  ;;  %p14_p9 = scmp.ge.s32.totalorder %s992_s21, 4   ;;  %s1263_s15 = smov %s927_s16 }
 0x353   : > { %s1264_s16 = smov %s931_s17  ;;  %s1265_s17 = smov %s1003_s24 }
 0x354   : > { %s1266_s18 = smov %s992_s21  ;;  %16 = sbr.rel (!%p14_p9) target bundleno = 3 (0x3), region = 72 }
 0x359   :  { %760 = vsyncpa [#allocation3], 1 }
 0x35a   :  { %762 = vsyncpa [#allocation3 + $0x1], 1 }

</bundles_post_ra>
